<compile_context>
chip_gen: v5e
topology: v5e:2x2
jax: 0.10.0
libtpu: 0.0.40
codegen_flags: <defaults>
</compile_context>

<pallas_src>
import functools

import jax
import jax.numpy as jnp
from jax.experimental import pallas as pl
from jax.experimental.pallas import tpu as pltpu


def _ceil_div(a, b):
    return -(-a // b)


def _sublane_for(dtype):
    itemsize = jnp.dtype(dtype).itemsize
    return {4: 8, 2: 16, 1: 32}.get(itemsize, 8)


def _device_kind():
    try:
        return jax.devices()[0].device_kind.lower()
    except Exception:
        return ""


def _chip_budgets():
    """Generation-aware (per-input tile bytes, scoped-VMEM ask)."""
    MiB = 1 << 20
    kind = _device_kind()
    if "v7" in kind:
        # 64 MiB physical VMEM, ~3.2 TB/s HBM: larger tiles amortize the
        # ~0.35 us/step overhead; 3 inputs x 2 buffers x 4 MiB = 24 MiB of
        # buffers + f32 temporaries stays well under 48 MiB.
        return 4 * MiB, 48 * MiB
    if "v6" in kind:
        # 128 MiB physical VMEM, ~1.4 TB/s HBM.
        return 6 * MiB, 80 * MiB
    if "v5" in kind and ("lite" in kind or "5e" in kind):
        # v5e: ~0.8 TB/s; per-step overhead <5% already at 2 MiB tiles.
        return 2 * MiB, 32 * MiB
    # Unknown chip (v4 / v5p / interpret): conservative defaults.
    return 2 * MiB, 32 * MiB


def _default_num_shards(total_tiles):
    """2 shards on chips with 2 TensorCores per chip/megacore, else 1."""
    if total_tiles < 2:
        return 1
    kind = _device_kind()
    if "v7" in kind or "v4" in kind or "v5p" in kind:
        return 2
    return 1


def _choose_block_rows(batch, feat, dtype, target_bytes):
    """Biggest sublane-aligned row tile whose per-input bytes ~= target."""
    itemsize = jnp.dtype(dtype).itemsize
    sublane = _sublane_for(dtype)
    rows = max(sublane, target_bytes // max(1, feat * itemsize))
    rows = (rows // sublane) * sublane
    padded_batch = _ceil_div(batch, sublane) * sublane
    rows = min(rows, padded_batch)
    return max(sublane, rows)


def _triplet_loss_kernel(a_ref, p_ref, n_ref, o_ref, *,
                         margin, batch, block_rows, tiles_per_shard, need_mask):
    c = pl.program_id(0)   # shard (TensorCore) axis
    i = pl.program_id(1)   # reduction axis within the shard

    @pl.when(i == 0)
    def _init():
        o_ref[...] = jnp.zeros_like(o_ref)

    # Keep HBM traffic at storage precision; upcast in VMEM.
    a = a_ref[...].astype(jnp.float32)
    p = p_ref[...].astype(jnp.float32)
    n = n_ref[...].astype(jnp.float32)

    # Per-row Euclidean distances: sqrt(sum((x1 - x2)^2, dim=1)).
    dpos = a - p
    dneg = a - n
    dist_p = jnp.sqrt(jnp.sum(dpos * dpos, axis=1, keepdims=True))  # (TB, 1)
    dist_n = jnp.sqrt(jnp.sum(dneg * dneg, axis=1, keepdims=True))  # (TB, 1)
    loss = jnp.maximum(dist_p - dist_n + margin, 0.0)               # (TB, 1)

    tile_start = (c * tiles_per_shard + i) * block_rows

    if need_mask:
        # Full tiles: plain accumulate (no per-step iota/where filler).
        @pl.when(tile_start + block_rows <= batch)
        def _full():
            o_ref[...] += jnp.sum(loss)

        # Tiles hanging off the end of the batch: mask rows >= batch by their
        # *logical* row index (robust even if the padded block re-reads data).
        @pl.when(tile_start + block_rows > batch)
        def _tail():
            row = tile_start + jax.lax.broadcasted_iota(jnp.int32, loss.shape, 0)
            o_ref[...] += jnp.sum(jnp.where(row < batch, loss, 0.0))
    else:
        o_ref[...] += jnp.sum(loss)


def triplet_loss(anchor, positive, negative, margin=1.0,
                 block_rows=None, num_shards=None):
    """Pallas TPU implementation of TripletLoss.forward -> scalar loss."""
    assert anchor.shape == positive.shape == negative.shape
    assert anchor.ndim == 2, "expected (B, D) embeddings"
    B, D = anchor.shape
    itemsize = jnp.dtype(anchor.dtype).itemsize
    sublane = _sublane_for(anchor.dtype)

    tile_bytes, vmem_limit = _chip_budgets()
    if block_rows is None:
        block_rows = _choose_block_rows(B, D, anchor.dtype, tile_bytes)
    assert block_rows % sublane == 0, (
        f"block_rows must be a multiple of the {sublane}-row sublane tile "
        f"for dtype {anchor.dtype}")

    total_tiles = _ceil_div(B, block_rows)
    if num_shards is None:
        num_shards = _default_num_shards(total_tiles)
    num_shards = max(1, min(int(num_shards), total_tiles))
    tiles_per_shard = _ceil_div(total_tiles, num_shards)
    padded_rows = num_shards * tiles_per_shard * block_rows
    need_mask = padded_rows > B

    kernel = functools.partial(
        _triplet_loss_kernel,
        margin=float(margin),
        batch=B,
        block_rows=block_rows,
        tiles_per_shard=tiles_per_shard,
        need_mask=need_mask,
    )

    in_spec = pl.BlockSpec((block_rows, D),
                           lambda c, i: (c * tiles_per_shard + i, 0))
    # Per-shard resident accumulator block, lane/sublane aligned.
    out_spec = pl.BlockSpec((1, 8, 128), lambda c, i: (c, 0, 0))

    # Advisory cost hint: this op is bytes-bound (3 streaming reads).
    cost = pl.CostEstimate(
        flops=8 * B * D,
        transcendentals=2 * B,
        bytes_accessed=3 * B * D * itemsize + num_shards * 8 * 128 * 4,
    )

    out = pl.pallas_call(
        kernel,
        out_shape=jax.ShapeDtypeStruct((num_shards, 8, 128), jnp.float32),
        grid_spec=pltpu.PrefetchScalarGridSpec(
            num_scalar_prefetch=0,
            grid=(num_shards, tiles_per_shard),
            in_specs=[in_spec, in_spec, in_spec],
            out_specs=out_spec,
        ),
        compiler_params=pltpu.CompilerParams(
            dimension_semantics=("parallel", "arbitrary"),
            vmem_limit_bytes=vmem_limit,
        ),
        cost_estimate=cost,
    )(anchor, positive, negative)

    return jnp.sum(out[:, 0, 0]) / B


def _reference_loss(a, p, n, margin=1.0):
    a = a.astype(jnp.float32)
    p = p.astype(jnp.float32)
    n = n.astype(jnp.float32)
    dp = jnp.sqrt(jnp.sum((a - p) ** 2, axis=1))
    dn = jnp.sqrt(jnp.sum((a - n) ** 2, axis=1))
    return jnp.mean(jnp.maximum(dp - dn + margin, 0.0))


if __name__ == "__main__":
    # 1) Small (B, D) embedding batch matching the module's convention.
    key = jax.random.PRNGKey(0)
    k1, k2, k3 = jax.random.split(key, 3)
    B, D = 8, 32
    anchor = jax.random.normal(k1, (B, D), dtype=jnp.float32)
    positive = jax.random.normal(k2, (B, D), dtype=jnp.float32)
    negative = jax.random.normal(k3, (B, D), dtype=jnp.float32)
    loss = jax.block_until_ready(triplet_loss(anchor, positive, negative, margin=1.0))
    ref = _reference_loss(anchor, positive, negative, margin=1.0)
    assert jnp.allclose(loss, ref, rtol=1e-5, atol=1e-5), (loss, ref)

    # 2) Tiled + 2-shard path with a partial tail tile (B not a multiple of the
    #    block): exercises the pipelined reduction, the per-shard accumulators
    #    and the pl.when-gated tail masking.
    k4, k5, k6 = jax.random.split(jax.random.PRNGKey(1), 3)
    B2, D2 = 200, 32
    a2 = jax.random.normal(k4, (B2, D2), dtype=jnp.float32)
    p2 = jax.random.normal(k5, (B2, D2), dtype=jnp.float32)
    n2 = jax.random.normal(k6, (B2, D2), dtype=jnp.float32)
    loss2 = jax.block_until_ready(
        triplet_loss(a2, p2, n2, margin=1.0, block_rows=64, num_shards=2))
    ref2 = _reference_loss(a2, p2, n2, margin=1.0)
    assert jnp.allclose(loss2, ref2, rtol=1e-5, atol=1e-5), (loss2, ref2)

    # 3) bf16 inputs exercise the dtype-aware (16-row) sublane rounding and the
    #    in-kernel f32 upcast.
    k7, k8, k9 = jax.random.split(jax.random.PRNGKey(2), 3)
    B3, D3 = 48, 128
    a3 = jax.random.normal(k7, (B3, D3), dtype=jnp.float32).astype(jnp.bfloat16)
    p3 = jax.random.normal(k8, (B3, D3), dtype=jnp.float32).astype(jnp.bfloat16)
    n3 = jax.random.normal(k9, (B3, D3), dtype=jnp.float32).astype(jnp.bfloat16)
    loss3 = jax.block_until_ready(triplet_loss(a3, p3, n3, margin=1.0))
    ref3 = _reference_loss(a3, p3, n3, margin=1.0)
    assert jnp.allclose(loss3, ref3, rtol=1e-3, atol=1e-3), (loss3, ref3)

    print("KERNEL_OK")
</pallas_src>

<mosaic_0001>
module attributes {stable_mosaic.version = 11 : i64} {
  func.func @_triplet_loss_kernel(%arg0: i32, %arg1: i32, %arg2: memref<8x32xf32, #tpu.memory_space<vmem>>, %arg3: memref<8x32xf32, #tpu.memory_space<vmem>>, %arg4: memref<8x32xf32, #tpu.memory_space<vmem>>, %arg5: memref<1x8x128xf32, #tpu.memory_space<vmem>>) attributes {dimension_semantics = [#tpu.dimension_semantics<parallel>, #tpu.dimension_semantics<arbitrary>], iteration_bounds = array<i64: 1, 1>, scalar_prefetch = 0 : i64, scratch_operands = 0 : i64, tpu.core_type = #tpu.core_type<tc>, window_params = [{transform_indices = @transform_0, window_bounds = array<i64: 8, 32>}, {transform_indices = @transform_1, window_bounds = array<i64: 8, 32>}, {transform_indices = @transform_2, window_bounds = array<i64: 8, 32>}, {transform_indices = @transform_3, window_bounds = array<i64: 1, 8, 128>}]} {
    %c0_i32 = arith.constant 0 : i32
    %0 = arith.cmpi eq, %arg1, %c0_i32 : i32
    %1 = arith.extui %0 : i1 to i32
    %c0_i32_0 = arith.constant 0 : i32
    %2 = arith.cmpi ne, %1, %c0_i32_0 : i32
    scf.if %2 {
      %cst_16 = arith.constant 0.000000e+00 : f32
      %29 = vector.broadcast %cst_16 : f32 to vector<1x8x128xf32>
      %c0_17 = arith.constant 0 : index
      %c0_18 = arith.constant 0 : index
      %c0_19 = arith.constant 0 : index
      %30 = vector.load %arg5[%c0_17, %c0_18, %c0_19] : memref<1x8x128xf32, #tpu.memory_space<vmem>>, vector<1x8x128xf32>
      tpu.vector_store %arg5[%c0_17, %c0_18, %c0_19], %29 {strides = array<i32>} : memref<1x8x128xf32, #tpu.memory_space<vmem>>, vector<1x8x128xf32>,
    } else {
    }
    %c0 = arith.constant 0 : index
    %c0_1 = arith.constant 0 : index
    %3 = vector.load %arg2[%c0, %c0_1] : memref<8x32xf32, #tpu.memory_space<vmem>>, vector<8x32xf32>
    %c0_2 = arith.constant 0 : index
    %c0_3 = arith.constant 0 : index
    %4 = vector.load %arg3[%c0_2, %c0_3] : memref<8x32xf32, #tpu.memory_space<vmem>>, vector<8x32xf32>
    %c0_4 = arith.constant 0 : index
    %c0_5 = arith.constant 0 : index
    %5 = vector.load %arg4[%c0_4, %c0_5] : memref<8x32xf32, #tpu.memory_space<vmem>>, vector<8x32xf32>
    %6 = arith.subf %3, %4 : vector<8x32xf32>
    %7 = arith.subf %3, %5 : vector<8x32xf32>
    %8 = arith.mulf %6, %6 : vector<8x32xf32>
    %cst = arith.constant dense<0.000000e+00> : vector<8xf32>
    %9 = vector.multi_reduction <add>, %8, %cst [1] : vector<8x32xf32> to vector<8xf32>
    %10 = vector.shape_cast %9 : vector<8xf32> to vector<8x1xf32>
    %11 = math.sqrt %10 : vector<8x1xf32>
    %12 = arith.mulf %7, %7 : vector<8x32xf32>
    %cst_6 = arith.constant dense<0.000000e+00> : vector<8xf32>
    %13 = vector.multi_reduction <add>, %12, %cst_6 [1] : vector<8x32xf32> to vector<8xf32>
    %14 = vector.shape_cast %13 : vector<8xf32> to vector<8x1xf32>
    %15 = math.sqrt %14 : vector<8x1xf32>
    %16 = arith.subf %11, %15 : vector<8x1xf32>
    %cst_7 = arith.constant 1.000000e+00 : f32
    %17 = vector.broadcast %cst_7 : f32 to vector<8x1xf32>
    %18 = arith.addf %16, %17 : vector<8x1xf32>
    %cst_8 = arith.constant 0.000000e+00 : f32
    %19 = vector.broadcast %cst_8 : f32 to vector<8x1xf32>
    %20 = arith.maximumf %18, %19 : vector<8x1xf32>
    %c0_9 = arith.constant 0 : index
    %c0_10 = arith.constant 0 : index
    %c0_11 = arith.constant 0 : index
    %21 = vector.load %arg5[%c0_9, %c0_10, %c0_11] : memref<1x8x128xf32, #tpu.memory_space<vmem>>, vector<1x8x128xf32>
    %22 = vector.shape_cast %20 : vector<8x1xf32> to vector<1x8x1xf32>
    %cst_12 = arith.constant dense<0.000000e+00> : vector<1xf32>
    %23 = vector.multi_reduction <add>, %22, %cst_12 [1, 2] : vector<1x8x1xf32> to vector<1xf32>
    %24 = vector.shape_cast %23 : vector<1xf32> to vector<1x1x1xf32>
    %25 = vector.extract %24[0, 0, 0] : f32 from vector<1x1x1xf32>
    %26 = vector.broadcast %25 : f32 to vector<1x8x128xf32>
    %27 = arith.addf %21, %26 : vector<1x8x128xf32>
    %c0_13 = arith.constant 0 : index
    %c0_14 = arith.constant 0 : index
    %c0_15 = arith.constant 0 : index
    %28 = vector.load %arg5[%c0_13, %c0_14, %c0_15] : memref<1x8x128xf32, #tpu.memory_space<vmem>>, vector<1x8x128xf32>
    tpu.vector_store %arg5[%c0_13, %c0_14, %c0_15], %27 {strides = array<i32>} : memref<1x8x128xf32, #tpu.memory_space<vmem>>, vector<1x8x128xf32>,
    return
  }
  func.func @transform_0(%arg0: i32, %arg1: i32) -> (i32, i32) {
    %c1_i32 = arith.constant 1 : i32
    %0 = arith.muli %arg0, %c1_i32 : i32
    %1 = arith.addi %0, %arg1 : i32
    %c0_i32 = arith.constant 0 : i32
    %c0_i32_0 = arith.constant 0 : i32
    return %1, %c0_i32 : i32, i32
  }
  func.func @transform_1(%arg0: i32, %arg1: i32) -> (i32, i32) {
    %c1_i32 = arith.constant 1 : i32
    %0 = arith.muli %arg0, %c1_i32 : i32
    %1 = arith.addi %0, %arg1 : i32
    %c0_i32 = arith.constant 0 : i32
    %c0_i32_0 = arith.constant 0 : i32
    return %1, %c0_i32 : i32, i32
  }
  func.func @transform_2(%arg0: i32, %arg1: i32) -> (i32, i32) {
    %c1_i32 = arith.constant 1 : i32
    %0 = arith.muli %arg0, %c1_i32 : i32
    %1 = arith.addi %0, %arg1 : i32
    %c0_i32 = arith.constant 0 : i32
    %c0_i32_0 = arith.constant 0 : i32
    return %1, %c0_i32 : i32, i32
  }
  func.func @transform_3(%arg0: i32, %arg1: i32) -> (i32, i32, i32) {
    %c0_i32 = arith.constant 0 : i32
    %c0_i32_0 = arith.constant 0 : i32
    %c0_i32_1 = arith.constant 0 : i32
    return %arg0, %c0_i32, %c0_i32_0 : i32, i32, i32
  }
}

</mosaic_0001>

<bundles_post_ra>
// kernel: tpu_custom_call.1
= control target key start
LH: loop header
LB: loop body
LE: loop exit
PB: predicated region body
PF: predicated region fallthrough
CT: control target
= control target key end

     0   :  { %8 = vsyncpa [#allocation3], 0  ;;  %s296_s0 = inlined_call_operand.hbm [shape: f32[8,32], index: 0, kind: input, shape index: {}]   ;;  %s297_s1 = inlined_call_operand.hbm [shape: f32[8,32], index: 1, kind: input, shape index: {}]   ;;  %s298_s2 = inlined_call_operand.hbm [shape: f32[8,32], index: 2, kind: input, shape index: {}]   ;;  %s299_s3 = inlined_call_operand.hbm [shape: f32[1,8,128], index: 3, kind: output, shape index: {}]  }
   0x1   :  { %9 = vsyncpa [#allocation6], 0  ;;  %s33_s14 = sshll.u32 %s297_s1, 4  ;;  %s34_s14 = int_to_ptr.hbm [resolvable:$true] %s33_s14 }
   0x2   :  { %10 = vsyncpa [#allocation4], 0  ;;  %s260_s15 = smov [#allocation5]   ;;  %s19_s19 = sshll.u32 %s296_s0, 4  ;;  %s20_s19 = int_to_ptr.hbm [resolvable:$true] %s19_s19 }
   0x3   :  { %s35_s16 = sshll.u32 %s260_s15, 4  ;;  %s261_s20 = smov [#allocation2]   ;;  %s36_s16 = int_to_ptr.vmem [resolvable:$true] %s35_s16 }
   0x4   :  { %38 = dma.hbm_to_vmem [thread:$0]  %s34_s14, 128, %s36_s16, [#allocation6]  }
   0x5   :  { %s21_s21 = sshll.u32 %s261_s20, 4  ;;  %s47_s24 = sshll.u32 %s298_s2, 4  ;;  %s22_s21 = int_to_ptr.vmem [resolvable:$true] %s21_s21  ;;  %s48_s24 = int_to_ptr.hbm [resolvable:$true] %s47_s24 }
   0x6   :  { %24 = dma.hbm_to_vmem [thread:$0]  %s20_s19, 128, %s22_s21, [#allocation3]  }
   0x7   :  { %s262_s1 = smov [#allocation7]  }
   0x8   :  { %s49_s25 = sshll.u32 %s262_s1, 4  ;;  %s50_s25 = int_to_ptr.vmem [resolvable:$true] %s49_s25 }
   0x9   :  { %52 = dma.hbm_to_vmem [thread:$0]  %s48_s24, 128, %s50_s25, [#allocation6]  }
   0xa   :  { %254 = dma.done.wait [#allocation3], 128  }
   0xb   :  { %255 = vsyncadd [#allocation3], 4294967168 }
   0xc   :  { %256 = dma.done.wait [#allocation6], 256  }
   0xd   :  { %257 = vsyncadd [#allocation6], 4294967040  ;;  %v73_v0 = vld [vmem:[#allocation2] sm:$0xff]  ;;  %v74_v1 = vld [vmem:[#allocation5] sm:$0xff]  ;;  %vm79_vm0 = vcmask 261120   ;;  %vm115_vm5 = vcmask 7168  }
   0xe   :  { %v75_v2 = vld [vmem:[#allocation7] sm:$0xff]  ;;  %v76_v3 = vsub.f32 %v73_v0, %v74_v1  ;;  %s263_s0 = smov [#allocation8]   ;;  %s136_s28 = sshll.u32 %s299_s3, 4  ;;  %s137_s28 = int_to_ptr.hbm [resolvable:$true] %s136_s28 }
   0xf   :  { %v77_v5 = vsub.f32 %v73_v0, %v75_v2  ;;  %s134_s2 = sshll.u32 %s263_s0, 4  ;;  %s135_s2 = int_to_ptr.vmem [resolvable:$true] %s134_s2 }
  0x10   :  { %v78_v4 = vmul.f32 %v76_v3, %v76_v3 }
  0x11   :  { %v95_v7 = vmul.f32 %v77_v5, %v77_v5 }
  0x12   :  { %v80_v6 = vsel %vm79_vm0, %v78_v4, 0.0 }
  0x13   :  { %81 = vadd.xlane.f32.xlu0 %v80_v6  ;;  %v96_v8 = vsel %vm79_vm0, %v95_v7, 0.0 }
  0x1b   :  { %97 = vadd.xlane.f32.xlu0 %v96_v8 }
  0x86   :  { %v82_v9 = vpop.xlane.xlu0 %81 }
  0x87   :  { %154 = vrsqrt.f32 %v82_v9  ;;  %vm90_vm1 = vcmp.eq.f32.partialorder %v82_v9, inf  ;;  %v93_v26 = vand.u32 2147483648, %v82_v9  ;;  %vm92_vm3 = vcmp.eq.f32.partialorder %v82_v9, 0.0 }
  0x8d   :  { %v155_v10 = vpop.eup %154 }
  0x8e   :  { %v84_v11 = vmul.f32 %v155_v10, %v82_v9  ;;  %v98_v12 = vpop.xlane.xlu0 %97 }
  0x8f   :  { %156 = vrsqrt.f32 %v98_v12  ;;  %vm106_vm2 = vcmp.eq.f32.partialorder %v98_v12, inf  ;;  %v109_v27 = vand.u32 2147483648, %v98_v12  ;;  %vm108_vm4 = vcmp.eq.f32.partialorder %v98_v12, 0.0 }
  0x90   :  { %v85_v13 = vmul.f32 %v155_v10, %v84_v11 }
  0x92   :  { %v86_v14 = vmul.f32 0.5, %v85_v13 }
  0x94   :  { %v87_v15 = vsub.f32 1.5, %v86_v14 }
  0x95   :  { %v157_v16 = vpop.eup %156 }
  0x96   :  { %v100_v17 = vmul.f32 %v157_v16, %v98_v12  ;;  %v88_v19 = vmul.f32 %v155_v10, %v87_v15 }
  0x98   :  { %v101_v18 = vmul.f32 %v157_v16, %v100_v17  ;;  %v89_v21 = vmul.f32 %v88_v19, %v82_v9 }
  0x9a   :  { %v102_v20 = vmul.f32 0.5, %v101_v18  ;;  %v91_v24 = vsel %vm90_vm1, %v82_v9, %v89_v21 }
  0x9b   :  { %v94_v29 = vsel %vm92_vm3, %v93_v26, %v91_v24 }
  0x9c   :  { %v103_v22 = vsub.f32 1.5, %v102_v20 }
  0x9e   :  { %v104_v23 = vmul.f32 %v157_v16, %v103_v22 }
  0xa0   :  { %v105_v25 = vmul.f32 %v104_v23, %v98_v12 }
  0xa2   :  { %v107_v28 = vsel %vm106_vm2, %v98_v12, %v105_v25 }
  0xa3   :  { %v110_v30 = vsel %vm108_vm4, %v109_v27, %v107_v28 }
  0xa4   :  { %v111_v31 = vsub.f32 %v94_v29, %v110_v30 }
  0xa6   :  { %v112_v32 = vadd.f32 1.0, %v111_v31 }
  0xa8   :  { %v113_v33 = vmax.f32 %v112_v32, 0.0 }
  0xaa   :  { %v116_v34 = vsel %vm115_vm5, %v113_v33, 0.0 }
  0xab   :  { %117 = vadd.xlane.f32.xlu1 %v116_v34 }
 0x11e   :  { %v118_v35 = vpop.xlane.xlu1 %117 }
 0x11f   :  { %v119_v36 = vrot.slane %v118_v35, 4 }
 0x121   :  { %v120_v37 = vadd.f32 %v119_v36, %v118_v35 }
 0x123   :  { %v121_v38 = vrot.slane %v120_v37, 2 }
 0x125   :  { %v122_v39 = vadd.f32 %v121_v38, %v120_v37 }
 0x127   :  { %v123_v40 = vrot.slane %v122_v39, 1 }
 0x129   :  { %v124_v41 = vadd.f32 %v123_v40, %v122_v39 }
 0x12b   :  { %147 = vpush %v124_v41 }
 0x15c   :  { %s148_s29 = spop %147 }
 0x15d   :  { %v126_v42 = vstv %s148_s29 }
 0x15e   :  { %128 = vst [vmem:[#allocation8] sm:$0xff] %v126_v42 }
 0x15f   :  { %139 = dma.vmem_to_hbm [thread:$0]  %s135_s2, 128, %s137_s28, [#allocation4]  }
 0x160   :  { %258 = dma.done.wait [#allocation4], 128  }
 0x161   :  { %259 = vsyncadd [#allocation4], 4294967168 }
 0x162   :  { %144 = vsyncpa [#allocation3], 1 }
 0x163   :  { %145 = vsyncpa [#allocation6], 1 }
 0x164   :  { %146 = vsyncpa [#allocation4], 1 }

</bundles_post_ra>
